<compile_context>
chip_gen: v7x
topology: tpu7x:2x2x1
jax: 0.10.0
libtpu: 0.0.40
codegen_flags: <defaults>
</compile_context>

<pallas_src>
import functools

import jax
import jax.numpy as jnp
from jax import lax
from jax.experimental import pallas as pl
from jax.experimental.pallas import tpu as pltpu

# Small, forward-consistent sizes (roberta_dim=768 -> H, len(rel2idx) -> R).
B = 2        # batch
S = 8        # sequence length
H = 32       # hidden ("roberta_dim")
R = 128      # number of relations (len(rel2idx)); lane-aligned
VOCAB = 64
LABEL_SMOOTHING = 0.1

# Lane-aligned relation tile. At production R, pick the largest multiple of
# 256 (v6e/v7x MXU) / 128 (v5e) whose double-buffered (H, R_TILE) weight
# blocks + a few [B, R_TILE] f32 temporaries fit the scoped VMEM budget.
R_TILE = 128
assert R % R_TILE == 0


def pruning_loss_kernel(cls_ref, w_ref, b_ref, rel_ref, loss_ref, *, num_rel, ls):
    """One R tile of: hidden2rel -> sigmoid -> label-smoothed BCE(sum).

    cls_ref : [B, H]       f32  CLS embeddings (resident across the R grid)
    w_ref   : [H, R_TILE]  f32  hidden2rel weight tile (streamed over R)
    b_ref   : [1, R_TILE]  f32  hidden2rel bias tile
    rel_ref : [B, 1]       i32  gold relation index per batch row
    loss_ref: [1]          f32  SMEM scalar accumulator (revisited across R grid)
    """
    k = pl.program_id(0)

    @pl.when(k == 0)
    def _init():
        loss_ref[0] = 0.0

    # hidden2rel linear layer for this relation tile (MXU matmul, f32 acc).
    z = jnp.dot(cls_ref[...], w_ref[...],
                preferred_element_type=jnp.float32) + b_ref[...]          # [B, R_TILE]

    # Label-smoothed one-hot built in-kernel: (1-ls)*onehot + 1/num_rel.
    col = lax.broadcasted_iota(jnp.int32, z.shape, 1) + k * R_TILE
    one_hot = (col == rel_ref[...]).astype(jnp.float32)
    actual = (1.0 - ls) * one_hot + 1.0 / num_rel                         # [B, R_TILE]

    # BCE from logits with a single shared transcendental chain:
    #   t = log1p(exp(-|z|)); softplus(z) = max(z,0)+t; softplus(-z) = softplus(z)-z
    #   log(sigmoid(z)) = -softplus(-z); log(1-sigmoid(z)) = -softplus(z)
    # torch.nn.BCELoss clamps both log terms at -100 -> keep for parity.
    t = jnp.log1p(jnp.exp(-jnp.abs(z)))
    sp_pos = jnp.maximum(z, 0.0) + t          # softplus(z)
    sp_neg = sp_pos - z                       # softplus(-z)
    log_p = jnp.maximum(-sp_neg, -100.0)
    log_1mp = jnp.maximum(-sp_pos, -100.0)
    per_elem = -(actual * log_p + (1.0 - actual) * log_1mp)               # [B, R_TILE]

    loss_ref[0] += jnp.sum(per_elem)


def pruning_model_loss(cls_emb, w, b, rel_idx):
    """cls_emb [B,H] f32, w [H,R] f32, b [1,R] f32, rel_idx [B] i32 -> scalar BCE sum."""
    b_real, h = cls_emb.shape
    h2, r = w.shape
    assert h == h2 and r % R_TILE == 0
    n_tiles = r // R_TILE
    rel_col = rel_idx.astype(jnp.int32).reshape(b_real, 1)

    kernel = functools.partial(pruning_loss_kernel, num_rel=r, ls=LABEL_SMOOTHING)

    cost = pl.CostEstimate(
        flops=2 * b_real * h * r + 10 * b_real * r,
        transcendentals=2 * b_real * r,            # one exp + one log1p per element
        bytes_accessed=4 * (b_real * h + h * r + r + b_real) + 4,
    )

    grid_spec = pltpu.PrefetchScalarGridSpec(
        num_scalar_prefetch=0,
        grid=(n_tiles,),
        in_specs=[
            pl.BlockSpec((b_real, h), lambda k: (0, 0)),        # cls   (resident)
            pl.BlockSpec((h, R_TILE), lambda k: (0, k)),        # W     (streamed over R)
            pl.BlockSpec((1, R_TILE), lambda k: (0, k)),        # bias  (streamed over R)
            pl.BlockSpec((b_real, 1), lambda k: (0, 0)),        # rel   (resident)
        ],
        out_specs=pl.BlockSpec((1,), lambda k: (0,),
                               memory_space=pltpu.MemorySpace.SMEM),
    )

    out = pl.pallas_call(
        kernel,
        out_shape=jax.ShapeDtypeStruct((1,), jnp.float32),
        grid_spec=grid_spec,
        compiler_params=pltpu.CompilerParams(
            dimension_semantics=("arbitrary",),     # reduction into the SMEM scalar
            vmem_limit_bytes=32 * 1024 * 1024,      # explicit, safe on v5e/v6e/v7x
        ),
        cost_estimate=cost,
    )(cls_emb, w, b, rel_col)
    # TODO(synk): on v7x, split the R grid across the 2 TensorCores (parallel
    # axis + per-core partial losses summed here) instead of one shared scalar.
    return out[0]


def cls_embedding_standin(question_tokenized, attention_mask, emb_table):
    """Deterministic stand-in for RobertaModel(...)[0].transpose(1,0)[0].

    Only the CLS (token-0) position is looked up — no [B, S, H] intermediate.
    """
    cls_tok = question_tokenized[:, 0]                                   # [B]
    cls_emb = emb_table[cls_tok]                                         # [B, H]
    return cls_emb * attention_mask[:, 0:1].astype(cls_emb.dtype)


@jax.jit
def pruning_forward(question_tokenized, attention_mask, emb_table, w, b, rel_idx):
    cls_emb = cls_embedding_standin(question_tokenized, attention_mask, emb_table)
    return pruning_model_loss(cls_emb, w, b, rel_idx)


if __name__ == "__main__":
    key = jax.random.PRNGKey(0)
    k_tok, k_emb, k_w, k_b, k_rel = jax.random.split(key, 5)

    # Inputs mirroring forward(question_tokenized, attention_mask, rel_one_hot);
    # the one-hot is carried as its int32 index (one-hot rebuilt in-kernel).
    question_tokenized = jax.random.randint(k_tok, (B, S), 0, VOCAB, dtype=jnp.int32)
    attention_mask = jnp.ones((B, S), dtype=jnp.float32)
    rel_idx = jax.random.randint(k_rel, (B,), 0, R, dtype=jnp.int32)

    # Deterministic parameters
    emb_table = jax.random.normal(k_emb, (VOCAB, H), dtype=jnp.float32) * 0.02
    w_hidden2rel = jax.random.normal(k_w, (H, R), dtype=jnp.float32) * 0.05
    b_hidden2rel = jax.random.normal(k_b, (1, R), dtype=jnp.float32) * 0.01

    loss = pruning_forward(question_tokenized, attention_mask, emb_table,
                           w_hidden2rel, b_hidden2rel, rel_idx)
    loss = jax.block_until_ready(loss)

    # Pure-JAX reference of the module's math (sigmoid -> clamped-log BCE sum)
    cls_ref = cls_embedding_standin(question_tokenized, attention_mask, emb_table)
    rel_one_hot = jax.nn.one_hot(rel_idx, R, dtype=jnp.float32)
    pred_ref = jax.nn.sigmoid(cls_ref @ w_hidden2rel + b_hidden2rel)
    actual_ref = (1.0 - LABEL_SMOOTHING) * rel_one_hot + 1.0 / R
    loss_ref_val = -jnp.sum(actual_ref * jnp.maximum(jnp.log(pred_ref), -100.0)
                            + (1.0 - actual_ref) * jnp.maximum(jnp.log(1.0 - pred_ref), -100.0))
    assert jnp.allclose(loss, loss_ref_val, rtol=1e-5, atol=1e-4), (loss, loss_ref_val)

    print("KERNEL_OK")
</pallas_src>

<mosaic_0001>
module attributes {stable_mosaic.version = 11 : i64} {
  func.func @pruning_loss_kernel(%arg0: i32, %arg1: memref<2x32xf32, #tpu.memory_space<vmem>>, %arg2: memref<32x128xf32, #tpu.memory_space<vmem>>, %arg3: memref<1x128xf32, #tpu.memory_space<vmem>>, %arg4: memref<2x1xi32, #tpu.memory_space<vmem>>, %arg5: memref<1xf32, #tpu.memory_space<smem>>) attributes {dimension_semantics = [#tpu.dimension_semantics<arbitrary>], iteration_bounds = array<i64: 1>, scalar_prefetch = 0 : i64, scratch_operands = 0 : i64, tpu.core_type = #tpu.core_type<tc>, window_params = [{pipeline_mode = #tpu.pipeline_mode<synchronous>, transform_indices = @transform_0, window_bounds = array<i64: 2, 32>}, {transform_indices = @transform_1, window_bounds = array<i64: 32, 128>}, {transform_indices = @transform_2, window_bounds = array<i64: 1, 128>}, {pipeline_mode = #tpu.pipeline_mode<synchronous>, transform_indices = @transform_3, window_bounds = array<i64: 2, 1>}, {transform_indices = @transform_4, window_bounds = array<i64: 1>}]} {
    %c0_i32 = arith.constant 0 : i32
    %0 = arith.cmpi eq, %arg0, %c0_i32 : i32
    %1 = arith.extui %0 : i1 to i32
    %c0_i32_0 = arith.constant 0 : i32
    %2 = arith.cmpi ne, %1, %c0_i32_0 : i32
    scf.if %2 {
      %cst_21 = arith.constant 0.000000e+00 : f32
      %c0_22 = arith.constant 0 : index
      %53 = memref.load %arg5[%c0_22] : memref<1xf32, #tpu.memory_space<smem>>
      memref.store %cst_21, %arg5[%c0_22] : memref<1xf32, #tpu.memory_space<smem>>
    } else {
    }
    %c0 = arith.constant 0 : index
    %c0_1 = arith.constant 0 : index
    %3 = vector.load %arg1[%c0, %c0_1] : memref<2x32xf32, #tpu.memory_space<vmem>>, vector<2x32xf32>
    %c0_2 = arith.constant 0 : index
    %c0_3 = arith.constant 0 : index
    %4 = vector.load %arg2[%c0_2, %c0_3] : memref<32x128xf32, #tpu.memory_space<vmem>>, vector<32x128xf32>
    %cst = arith.constant dense<0.000000e+00> : vector<2x128xf32>
    %5 = tpu.matmul %3, %4, %cst {dimension_numbers = #tpu.dot_dimension_numbers<[1], [0], [0], [1], [0, 0, 1, 1], [], []>} : vector<2x32xf32>, vector<32x128xf32>, vector<2x128xf32> -> vector<2x128xf32>
    %c0_4 = arith.constant 0 : index
    %c0_5 = arith.constant 0 : index
    %6 = vector.load %arg3[%c0_4, %c0_5] : memref<1x128xf32, #tpu.memory_space<vmem>>, vector<1x128xf32>
    %7 = vector.broadcast %6 : vector<1x128xf32> to vector<2x128xf32>
    %8 = arith.addf %5, %7 : vector<2x128xf32>
    %9 = tpu.iota {dimensions = array<i32: 1>} : vector<2x128xi32>
    %c128_i32 = arith.constant 128 : i32
    %10 = arith.muli %arg0, %c128_i32 : i32
    %11 = vector.broadcast %10 : i32 to vector<2x128xi32>
    %12 = arith.addi %9, %11 : vector<2x128xi32>
    %c0_6 = arith.constant 0 : index
    %c0_7 = arith.constant 0 : index
    %13 = vector.load %arg4[%c0_6, %c0_7] : memref<2x1xi32, #tpu.memory_space<vmem>>, vector<2x1xi32>
    %14 = vector.broadcast %13 : vector<2x1xi32> to vector<2x128xi32>
    %15 = arith.cmpi eq, %12, %14 : vector<2x128xi32>
    %16 = arith.extui %15 : vector<2x128xi1> to vector<2x128xi32>
    %17 = arith.sitofp %16 : vector<2x128xi32> to vector<2x128xf32>
    %cst_8 = arith.constant 0.899999976 : f32
    %18 = vector.broadcast %cst_8 : f32 to vector<2x128xf32>
    %19 = arith.mulf %18, %17 : vector<2x128xf32>
    %cst_9 = arith.constant 7.812500e-03 : f32
    %20 = vector.broadcast %cst_9 : f32 to vector<2x128xf32>
    %21 = arith.addf %19, %20 : vector<2x128xf32>
    %22 = math.absf %8 : vector<2x128xf32>
    %cst_10 = arith.constant 0.000000e+00 : f32
    %23 = vector.broadcast %cst_10 : f32 to vector<2x128xf32>
    %24 = arith.subf %23, %22 : vector<2x128xf32>
    %25 = math.exp %24 : vector<2x128xf32>
    %26 = math.log1p %25 : vector<2x128xf32>
    %cst_11 = arith.constant 0.000000e+00 : f32
    %27 = vector.broadcast %cst_11 : f32 to vector<2x128xf32>
    %28 = arith.maximumf %8, %27 : vector<2x128xf32>
    %29 = arith.addf %28, %26 : vector<2x128xf32>
    %30 = arith.subf %29, %8 : vector<2x128xf32>
    %cst_12 = arith.constant 0.000000e+00 : f32
    %31 = vector.broadcast %cst_12 : f32 to vector<2x128xf32>
    %32 = arith.subf %31, %30 : vector<2x128xf32>
    %cst_13 = arith.constant -1.000000e+02 : f32
    %33 = vector.broadcast %cst_13 : f32 to vector<2x128xf32>
    %34 = arith.maximumf %32, %33 : vector<2x128xf32>
    %cst_14 = arith.constant 0.000000e+00 : f32
    %35 = vector.broadcast %cst_14 : f32 to vector<2x128xf32>
    %36 = arith.subf %35, %29 : vector<2x128xf32>
    %cst_15 = arith.constant -1.000000e+02 : f32
    %37 = vector.broadcast %cst_15 : f32 to vector<2x128xf32>
    %38 = arith.maximumf %36, %37 : vector<2x128xf32>
    %39 = arith.mulf %21, %34 : vector<2x128xf32>
    %cst_16 = arith.constant 1.000000e+00 : f32
    %40 = vector.broadcast %cst_16 : f32 to vector<2x128xf32>
    %41 = arith.subf %40, %21 : vector<2x128xf32>
    %42 = arith.mulf %41, %38 : vector<2x128xf32>
    %43 = arith.addf %39, %42 : vector<2x128xf32>
    %cst_17 = arith.constant 0.000000e+00 : f32
    %44 = vector.broadcast %cst_17 : f32 to vector<2x128xf32>
    %45 = arith.subf %44, %43 : vector<2x128xf32>
    %c0_18 = arith.constant 0 : index
    %46 = memref.load %arg5[%c0_18] : memref<1xf32, #tpu.memory_space<smem>>
    %47 = vector.shape_cast %45 : vector<2x128xf32> to vector<1x2x128xf32>
    %cst_19 = arith.constant dense<0.000000e+00> : vector<1xf32>
    %48 = vector.multi_reduction <add>, %47, %cst_19 [1, 2] : vector<1x2x128xf32> to vector<1xf32>
    %49 = vector.shape_cast %48 : vector<1xf32> to vector<1x1x1xf32>
    %50 = vector.extract %49[0, 0, 0] : f32 from vector<1x1x1xf32>
    %51 = arith.addf %46, %50 : f32
    %c0_20 = arith.constant 0 : index
    %52 = memref.load %arg5[%c0_20] : memref<1xf32, #tpu.memory_space<smem>>
    memref.store %51, %arg5[%c0_20] : memref<1xf32, #tpu.memory_space<smem>>
    return
  }
  func.func @transform_0(%arg0: i32) -> (i32, i32) {
    %c0_i32 = arith.constant 0 : i32
    %c0_i32_0 = arith.constant 0 : i32
    %c0_i32_1 = arith.constant 0 : i32
    return %c0_i32, %c0_i32_0 : i32, i32
  }
  func.func @transform_1(%arg0: i32) -> (i32, i32) {
    %c0_i32 = arith.constant 0 : i32
    %c0_i32_0 = arith.constant 0 : i32
    return %c0_i32, %arg0 : i32, i32
  }
  func.func @transform_2(%arg0: i32) -> (i32, i32) {
    %c0_i32 = arith.constant 0 : i32
    %c0_i32_0 = arith.constant 0 : i32
    return %c0_i32, %arg0 : i32, i32
  }
  func.func @transform_3(%arg0: i32) -> (i32, i32) {
    %c0_i32 = arith.constant 0 : i32
    %c0_i32_0 = arith.constant 0 : i32
    %c0_i32_1 = arith.constant 0 : i32
    return %c0_i32, %c0_i32_0 : i32, i32
  }
  func.func @transform_4(%arg0: i32) -> i32 {
    %c0_i32 = arith.constant 0 : i32
    %c0_i32_0 = arith.constant 0 : i32
    return %c0_i32 : i32
  }
}

</mosaic_0001>

<bundles_post_ra>
// kernel: pruning_forward.1
= control target key start
LH: loop header
LB: loop body
LE: loop exit
PB: predicated region body
PF: predicated region fallthrough
CT: control target
= control target key end

     0   :  { %v227_v3 = vmov 0.0|0.0   ;;  %vm228_vm0 = vmmov 0   ;;  %v229_v6 = vmov 0.0   ;;  %v230_v7 = vmov 0   ;;  %s290_s0 = inlined_call_operand.vmem [shape: f32[2,32], index: 0, kind: input, shape index: {}]   ;;  %s291_s1 = inlined_call_operand.vmem [shape: f32[32,128], index: 1, kind: input, shape index: {}]   ;;  %s292_s2 = inlined_call_operand.vmem [shape: f32[1,128], index: 2, kind: input, shape index: {}]   ;;  %s293_s3 = inlined_call_operand.vmem [shape: s32[2,1], index: 3, kind: input, shape index: {}]   ;;  %s294_s4 = inlined_call_operand.hbm [shape: f32[1], index: 4, kind: output, shape index: {}]  }
   0x1   :  { %v25_v0 = vld [vmem:[%s291_s1] sm:$0xff]  ;;  %v26_v1 = vld [vmem:[%s291_s1 + $0x8] sm:$0xff]  ;;  %v27_v2 = vld [vmem:[%s291_s1 + $0x10] sm:$0xff]  ;;  %196 = vmatprep.subr.bf16.mxu0 %v227_v3  ;;  %193 = vmatprep.mubr.msk.f32.mxu0 %vm228_vm0, %v229_v6 }
   0x2   :  { %v197_v4 = vpack.c.bf16 %v26_v1, %v25_v0  ;;  %v28_v5 = vld [vmem:[%s291_s1 + $0x18] sm:$0xff]  ;;  %210 = vset.pattern.permute.xlu0 %v230_v7  ;;  %v115_v8 = vld [vmem:[%s293_s3] sm:$0x3] }
   0x3   :  { %9 = vsyncpa [#allocation3], 0  ;;  %v200_v9 = vpack.c.bf16 %v28_v5, %v27_v2  ;;  %117 = vperm.xlu0 %210, %v115_v8   ;;  %v24_v10 = vld [vmem:[%s290_s0] sm:$0x3]  ;;  %vm36_vm1 = vcmask 261120   ;;  %v110_v18 = vlaneseq  ;;  %vm150_vm4 = vcmask 1041408  }
   0x4   :  { %198 = vmatpush3.bf16.msra.mxu0 %v197_v4  ;;  %v177_v11 = vld [vmem:[%s292_s2] ss:$0 sm:$0xff]  ;;  %s215_s28 = scalar_lea.hbm %s294_s4, 16 }
   0x5   :  { %199 = vmatprep.subr.bf16.mxu0 %v227_v3  ;;  %v111_v21 = vand.u32 127, %v110_v18  ;;  %p216_p0 = scmp.ne.s32.totalorder %s294_s4, %s215_s28  ;;  %p219_p1 = scmp.lt.u32.totalorder %s215_s28, %s294_s4 }
   0x7   :  { %p221_p2 = pnand %p219_p1, %p216_p0 }
   0x8   :  { %201 = vmatpush3.bf16.msra.mxu0 %v200_v9 }
   0xb   :  { %194 = vmatmul.mubr.msk.f32.vlgmr.msra.gmra.mrb[0].mxu0 %vm36_vm1, %v24_v10 }
  0x82   :  { %v118_v22 = vpop.permute.xlu0 %117 }
  0x83   :  { %vm119_vm2 = vcmp.eq.s32.totalorder %v111_v21, %v118_v22 }
  0x84   :  { %v179_v25 = vsel %vm119_vm2, 1.0, %v229_v6 }
  0x85   :  { %v122_v28 = vmul.f32 0.9, %v179_v25 }
  0x87   :  { %v123_v34 = vadd.f32 0.0078125, %v122_v28 }
  0x89   :  { %v145_v38 = vsub.f32 1.0, %v123_v34 }
  0xde   :  { %v106_v12 = vpop.f32.mrb[0].mxu0 }
  0xdf   :  { %v107_v13 = vadd.f32 %v177_v11, %v106_v12  ;;  %v195_v14 = vpop.f32.mrb[1].mxu0 }
  0xe1   :  { %v124_v15 = vand.u32 2147483647, %v107_v13  ;;  %v137_v31 = vmax.f32 %v107_v13, 0.0 }
  0xe3   :  { %v125_v16 = vsub.f32 0.0, %v124_v15 }
  0xe5   :  { %v126_v17 = vmul.f32 1.442695, %v125_v16 }
  0xe7   :  { %211 = vpow2.f32 %v126_v17 }
  0xf1   :  { %v212_v19 = vpop.eup %211 }
  0xf2   :  { %v128_v20 = vadd.f32 1.0, %v212_v19  ;;  %v131_v23 = vmul.f32 -0.5, %v212_v19  ;;  %v134_v26 = vand.u32 2147483647, %v212_v19 }
  0xf4   :  { %213 = vlog2.f32 %v128_v20  ;;  %v132_v24 = vadd.f32 1.0, %v131_v23  ;;  %vm135_vm3 = vcmp.lt.f32.partialorder %v134_v26, 0.0004427343 }
  0xf6   :  { %v133_v30 = vmul.f32 %v212_v19, %v132_v24 }
  0xfe   :  { %v214_v27 = vpop.eup %213 }
  0xff   :  { %v130_v29 = vmul.f32 0.6931472, %v214_v27 }
 0x101   :  { %v136_v32 = vsel %vm135_vm3, %v133_v30, %v130_v29 }
 0x102   :  { %v138_v33 = vadd.f32 %v137_v31, %v136_v32 }
 0x104   :  { %v139_v35 = vsub.f32 %v138_v33, %v107_v13  ;;  %v142_v36 = vsub.f32 0.0, %v138_v33 }
 0x106   :  { %v140_v37 = vsub.f32 0.0, %v139_v35  ;;  %v143_v39 = vmax.f32 %v142_v36, -100.0 }
 0x108   :  { %v141_v40 = vmax.f32 %v140_v37, -100.0  ;;  %v146_v42 = vmul.f32 %v145_v38, %v143_v39 }
 0x10a   :  { %v144_v41 = vmul.f32 %v141_v40, %v123_v34 }
 0x10c   :  { %v147_v43 = vadd.f32 %v146_v42, %v144_v41 }
 0x10e   :  { %v148_v44 = vsub.f32 0.0, %v147_v43 }
 0x110   :  { %v151_v45 = vsel %vm150_vm4, %v148_v44, 0.0 }
 0x111   :  { %152 = vadd.xlane.f32.xlu0 %v151_v45 }
 0x19e   :  { %v153_v46 = vpop.xlane.xlu0 %152 }
 0x19f   :  { %v154_v47 = vrot.slane %v153_v46, 4 }
 0x1a1   :  { %v155_v48 = vadd.f32 %v154_v47, %v153_v46 }
 0x1a3   :  { %v156_v49 = vrot.slane %v155_v48, 2 }
 0x1a5   :  { %v157_v50 = vadd.f32 %v156_v49, %v155_v48 }
 0x1a7   :  { %v158_v51 = vrot.slane %v157_v50, 1 }
 0x1a9   :  { %v159_v52 = vadd.f32 %v158_v51, %v157_v50 }
 0x1ab   :  { %202 = vpush %v159_v52 }
 0x1dc   :  { %s203_s0 = spop %202 }
 0x1dd   :  { %163 = sst [smem:[#allocation2]] %s203_s0 }
 0x1de   :  { %224 = shalt.err (!%p221_p2)
}
 0x1df   :  { %s231_s7 = smov [#allocation2]  }
 0x1e0   :  { %171 = dma.smem_to_hbm %s231_s7, 16, %s294_s4, [#allocation3]  }
 0x1e1   :  { %225 = dma.done.wait [#allocation3], 16  }
 0x1e2   :  { %226 = vsyncadd [#allocation3], 4294967280 }
 0x1e3   :  { %175 = sfence }
 0x1e4   :  { %176 = vsyncpa [#allocation3], 1 }

</bundles_post_ra>
